<compile_context>
chip_gen: v7x
topology: tpu7x:2x2x1
jax: 0.10.0
libtpu: 0.0.40
codegen_flags: <defaults>
</compile_context>

<pallas_src>
import functools

import jax
import jax.numpy as jnp
import numpy as np
from jax import lax
from jax.experimental import pallas as pl
from jax.experimental.pallas import tpu as pltpu


def _round_up(x, m):
    return ((x + m - 1) // m) * m


def _c_iter_kernel(beta_ref,                        # SMEM: (B,) inertia scalars
                   a_ref, wt_ref, rx_ref, c_ref, cj_ref,   # VMEM input tiles
                   *out_refs,                        # VMEM output tiles (1 or 2)
                   n_updates, eps):
    c_out_ref = out_refs[0]
    cj_out_ref = out_refs[1] if len(out_refs) > 1 else None

    beta_c = beta_ref[pl.program_id(0)]

    f32 = jnp.float32
    A = a_ref[0]                       # (K, K)  f32: I - c_c*(W^T W + alpha*I)
    Wt = wt_ref[0]                     # (K, M)  f32: c_c * W^T
    rx = rx_ref[0].astype(f32)         # (M, TN)
    # bb = c_c * W^T Rx, computed once per tile (fused, never hits HBM).
    bb = jnp.dot(Wt, rx, preferred_element_type=f32)          # (K, TN)

    C = c_ref[0].astype(f32)           # (K, TN)
    C_j_1 = cj_ref[0].astype(f32)      # (K, TN)

    def body(C, C_j_1):
        C_prev = C
        # inertial_step
        Ci = C + beta_c * (C - C_j_1)
        # gradient_step (Gram form):  Ci - c_c*grad  ==  A @ Ci + bb
        Cg = jnp.dot(A, Ci, preferred_element_type=f32) + bb
        # prox_step: projection onto {C >= eps}
        C_new = jnp.maximum(Cg, eps)
        # update() returns (C_prox, C): new C_j_1 is the pre-update C
        return C_new, C_prev

    if n_updates <= 8:
        for _ in range(n_updates):
            C, C_j_1 = body(C, C_j_1)
    else:
        C, C_j_1 = lax.fori_loop(0, n_updates,
                                 lambda i, carry: body(*carry),
                                 (C, C_j_1))

    c_out_ref[0] = C.astype(c_out_ref.dtype)
    if cj_out_ref is not None:
        cj_out_ref[0] = C_j_1.astype(cj_out_ref.dtype)


def c_iter_forward(Rx, C, C_j_1, W_updated, c_c, beta_c, alpha, eps,
                   n_updates_c, *, tn_max=32768, io_dtype=jnp.float32,
                   vmem_limit_bytes=48 * 1024 * 1024):
    """Pallas implementation of C_iter.forward.

    Rx:        (B, M, H, W)   observed data
    C, C_j_1:  (B, K, H, W)   current / previous coefficients
    W_updated: (B, M, K)      mixing matrix
    c_c, beta_c: (B,)         per-batch step / inertia scalars
    alpha, eps: python floats
    Returns (C_new, C_j_1_new, C_i_1), each (B, K, H, W).
    """
    n_updates = int(n_updates_c)
    out_dtype = C.dtype
    if n_updates == 0:
        return C, C_j_1, C

    B, M, H, Wd = Rx.shape
    K = C.shape[1]
    N = H * Wd
    f32 = jnp.float32
    io = jnp.dtype(io_dtype)

    Rx_f = Rx.reshape(B, M, N).astype(io)
    C_f = C.reshape(B, K, N).astype(io)
    Cj_f = C_j_1.reshape(B, K, N).astype(io)
    W_f = W_updated.astype(f32)
    cc = c_c.astype(f32)
    bc = beta_c.astype(f32)

    # --- tiny one-off per-batch precompute in plain XLA (Gram form) ---
    eyeK = jnp.eye(K, dtype=f32)
    G = jnp.einsum('bmk,bml->bkl', W_f, W_f)                       # (B, K, K)
    A = eyeK[None] - cc[:, None, None] * (G + alpha * eyeK[None])  # (B, K, K)
    Wt = cc[:, None, None] * jnp.swapaxes(W_f, 1, 2)               # (B, K, M)

    # --- pick a lane-dense TN under a conservative VMEM budget -----------
    # per-column VMEM bytes: double-buffered io tiles (Rx + C + Cj + up to 2
    # outputs) plus ~6 K-rows of f32 working set for the in-kernel values.
    per_col = 2 * (M + 4 * K) * io.itemsize + 6 * K * 4
    budget = (vmem_limit_bytes * 2) // 3
    tn_budget = max(128, (budget // per_col) // 128 * 128)
    TN = int(min(tn_max, tn_budget, _round_up(N, 128)))
    n_tiles = pl.cdiv(N, TN)         # partial final tile handled by Pallas

    write_cj = n_updates > 1         # n_updates==1 -> C_j_1_new == input C

    kernel = functools.partial(_c_iter_kernel,
                               n_updates=n_updates, eps=float(eps))

    smem_spec = pl.BlockSpec(memory_space=pltpu.MemorySpace.SMEM)
    a_spec = pl.BlockSpec((1, K, K), lambda b, n: (b, 0, 0))
    wt_spec = pl.BlockSpec((1, K, M), lambda b, n: (b, 0, 0))
    rx_spec = pl.BlockSpec((1, M, TN), lambda b, n: (b, 0, n))
    coef_spec = pl.BlockSpec((1, K, TN), lambda b, n: (b, 0, n))

    out_shape = [jax.ShapeDtypeStruct((B, K, N), io)]
    out_specs = [coef_spec]
    if write_cj:
        out_shape.append(jax.ShapeDtypeStruct((B, K, N), io))
        out_specs.append(coef_spec)

    outs = pl.pallas_call(
        kernel,
        out_shape=tuple(out_shape),
        grid=(B, n_tiles),
        in_specs=[
            smem_spec,    # beta_c
            a_spec,       # A   (per-batch, reused across N tiles)
            wt_spec,      # c_c * W^T
            rx_spec,      # Rx tile
            coef_spec,    # C
            coef_spec,    # C_j_1
        ],
        out_specs=out_specs,
        compiler_params=pltpu.CompilerParams(
            dimension_semantics=("parallel", "parallel"),
            vmem_limit_bytes=int(vmem_limit_bytes)),
    )(bc, A, Wt, Rx_f, C_f, Cj_f)

    shape4 = (B, K, H, Wd)
    C_new = outs[0].reshape(shape4).astype(out_dtype)
    if write_cj:
        Cj_new = outs[1].reshape(shape4).astype(out_dtype)
    else:
        Cj_new = C            # exactly the input C for a single update
    C_i_1 = C                 # C_i_1 = C.clone(): pure copy of the input
    return C_new, Cj_new, C_i_1


def c_iter_reference(Rx, C, C_j_1, W_updated, c_c, beta_c, alpha, eps,
                     n_updates_c):
    """Pure-JAX reference mirroring the PyTorch forward (two-matmul form)."""
    cc = c_c[:, None, None, None]
    bc = beta_c[:, None, None, None]
    C_i_1 = C
    for _ in range(n_updates_c):
        C_prev = C
        Ci = C + bc * (C - C_j_1)
        WC = jnp.einsum('bmk,bkhw->bmhw', W_updated, Ci)
        grad = jnp.einsum('bmk,bmhw->bkhw', W_updated, WC - Rx) + alpha * Ci
        Cg = Ci - cc * grad
        C = jnp.maximum(Cg, eps)
        C_j_1 = C_prev
    return C, C_j_1, C_i_1


if __name__ == "__main__":
    B, M, K, H, W = 2, 8, 8, 16, 16
    N_UPDATES_C = 3
    alpha = 0.1
    eps = 1e-3

    key = jax.random.PRNGKey(0)
    k_rx, k_c, k_cj, k_w, k_cc, k_bc = jax.random.split(key, 6)

    Rx = jax.random.normal(k_rx, (B, M, H, W), dtype=jnp.float32)
    C = jnp.abs(jax.random.normal(k_c, (B, K, H, W), dtype=jnp.float32))
    C_j_1 = jnp.abs(jax.random.normal(k_cj, (B, K, H, W), dtype=jnp.float32))
    W_updated = jax.random.normal(k_w, (B, M, K), dtype=jnp.float32)
    c_c = 0.05 + 0.01 * jax.random.uniform(k_cc, (B,), dtype=jnp.float32)
    beta_c = 0.3 + 0.1 * jax.random.uniform(k_bc, (B,), dtype=jnp.float32)

    # --- f32 I/O, multi-update path ---
    out = c_iter_forward(Rx, C, C_j_1, W_updated, c_c, beta_c,
                         alpha, eps, N_UPDATES_C)
    out = jax.block_until_ready(out)
    ref = c_iter_reference(Rx, C, C_j_1, W_updated, c_c, beta_c,
                           alpha, eps, N_UPDATES_C)
    for got, want in zip(out, ref):
        np.testing.assert_allclose(np.asarray(got), np.asarray(want),
                                   rtol=1e-2, atol=1e-2)

    # --- n_updates == 1 fast path (single-output kernel variant) ---
    out1 = jax.block_until_ready(
        c_iter_forward(Rx, C, C_j_1, W_updated, c_c, beta_c, alpha, eps, 1))
    ref1 = c_iter_reference(Rx, C, C_j_1, W_updated, c_c, beta_c,
                            alpha, eps, 1)
    for got, want in zip(out1, ref1):
        np.testing.assert_allclose(np.asarray(got), np.asarray(want),
                                   rtol=1e-2, atol=1e-2)

    # --- bf16 HBM streams (in-kernel math stays f32); loose tolerance ---
    out_bf = jax.block_until_ready(
        c_iter_forward(Rx, C, C_j_1, W_updated, c_c, beta_c,
                       alpha, eps, N_UPDATES_C, io_dtype=jnp.bfloat16))
    for got, want in zip(out_bf, ref):
        np.testing.assert_allclose(np.asarray(got, dtype=np.float32),
                                   np.asarray(want), rtol=6e-2, atol=6e-2)

    print("KERNEL_OK")
</pallas_src>

<mosaic_0001>
module attributes {stable_mosaic.version = 11 : i64} {
  func.func @_c_iter_kernel(%arg0: i32, %arg1: i32, %arg2: memref<2xf32, #tpu.memory_space<smem>>, %arg3: memref<1x8x8xf32, #tpu.memory_space<vmem>>, %arg4: memref<1x8x8xf32, #tpu.memory_space<vmem>>, %arg5: memref<1x8x256xf32, #tpu.memory_space<vmem>>, %arg6: memref<1x8x256xf32, #tpu.memory_space<vmem>>, %arg7: memref<1x8x256xf32, #tpu.memory_space<vmem>>, %arg8: memref<1x8x256xf32, #tpu.memory_space<vmem>>, %arg9: memref<1x8x256xf32, #tpu.memory_space<vmem>>) attributes {dimension_semantics = [#tpu.dimension_semantics<parallel>, #tpu.dimension_semantics<parallel>], iteration_bounds = array<i64: 2, 1>, scalar_prefetch = 0 : i64, scratch_operands = 0 : i64, tpu.core_type = #tpu.core_type<tc>, window_params = [{transform_indices = @transform_0, window_bounds = array<i64: 2>}, {transform_indices = @transform_1, window_bounds = array<i64: 1, 8, 8>}, {transform_indices = @transform_2, window_bounds = array<i64: 1, 8, 8>}, {transform_indices = @transform_3, window_bounds = array<i64: 1, 8, 256>}, {transform_indices = @transform_4, window_bounds = array<i64: 1, 8, 256>}, {transform_indices = @transform_5, window_bounds = array<i64: 1, 8, 256>}, {transform_indices = @transform_6, window_bounds = array<i64: 1, 8, 256>}, {transform_indices = @transform_7, window_bounds = array<i64: 1, 8, 256>}]} {
    %0 = arith.index_cast %arg0 : i32 to index
    %1 = memref.load %arg2[%0] : memref<2xf32, #tpu.memory_space<smem>>
    %c0 = arith.constant 0 : index
    %c0_0 = arith.constant 0 : index
    %c0_1 = arith.constant 0 : index
    %2 = vector.load %arg3[%c0, %c0_0, %c0_1] : memref<1x8x8xf32, #tpu.memory_space<vmem>>, vector<1x8x8xf32>
    %3 = vector.shape_cast %2 : vector<1x8x8xf32> to vector<8x8xf32>
    %c0_2 = arith.constant 0 : index
    %c0_3 = arith.constant 0 : index
    %c0_4 = arith.constant 0 : index
    %4 = vector.load %arg4[%c0_2, %c0_3, %c0_4] : memref<1x8x8xf32, #tpu.memory_space<vmem>>, vector<1x8x8xf32>
    %5 = vector.shape_cast %4 : vector<1x8x8xf32> to vector<8x8xf32>
    %c0_5 = arith.constant 0 : index
    %c0_6 = arith.constant 0 : index
    %c0_7 = arith.constant 0 : index
    %6 = vector.load %arg5[%c0_5, %c0_6, %c0_7] : memref<1x8x256xf32, #tpu.memory_space<vmem>>, vector<1x8x256xf32>
    %7 = vector.shape_cast %6 : vector<1x8x256xf32> to vector<8x256xf32>
    %cst = arith.constant dense<0.000000e+00> : vector<8x256xf32>
    %8 = tpu.matmul %5, %7, %cst {dimension_numbers = #tpu.dot_dimension_numbers<[1], [0], [0], [1], [0, 0, 1, 1], [], []>} : vector<8x8xf32>, vector<8x256xf32>, vector<8x256xf32> -> vector<8x256xf32>
    %c0_8 = arith.constant 0 : index
    %c0_9 = arith.constant 0 : index
    %c0_10 = arith.constant 0 : index
    %9 = vector.load %arg6[%c0_8, %c0_9, %c0_10] : memref<1x8x256xf32, #tpu.memory_space<vmem>>, vector<1x8x256xf32>
    %10 = vector.shape_cast %9 : vector<1x8x256xf32> to vector<8x256xf32>
    %c0_11 = arith.constant 0 : index
    %c0_12 = arith.constant 0 : index
    %c0_13 = arith.constant 0 : index
    %11 = vector.load %arg7[%c0_11, %c0_12, %c0_13] : memref<1x8x256xf32, #tpu.memory_space<vmem>>, vector<1x8x256xf32>
    %12 = vector.shape_cast %11 : vector<1x8x256xf32> to vector<8x256xf32>
    %13 = arith.subf %10, %12 : vector<8x256xf32>
    %14 = vector.broadcast %1 : f32 to vector<8x256xf32>
    %15 = arith.mulf %14, %13 : vector<8x256xf32>
    %16 = arith.addf %10, %15 : vector<8x256xf32>
    %cst_14 = arith.constant dense<0.000000e+00> : vector<8x256xf32>
    %17 = tpu.matmul %3, %16, %cst_14 {dimension_numbers = #tpu.dot_dimension_numbers<[1], [0], [0], [1], [0, 0, 1, 1], [], []>} : vector<8x8xf32>, vector<8x256xf32>, vector<8x256xf32> -> vector<8x256xf32>
    %18 = arith.addf %17, %8 : vector<8x256xf32>
    %cst_15 = arith.constant 1.000000e-03 : f32
    %19 = vector.broadcast %cst_15 : f32 to vector<8x256xf32>
    %20 = arith.maximumf %18, %19 : vector<8x256xf32>
    %21 = arith.subf %20, %10 : vector<8x256xf32>
    %22 = vector.broadcast %1 : f32 to vector<8x256xf32>
    %23 = arith.mulf %22, %21 : vector<8x256xf32>
    %24 = arith.addf %20, %23 : vector<8x256xf32>
    %cst_16 = arith.constant dense<0.000000e+00> : vector<8x256xf32>
    %25 = tpu.matmul %3, %24, %cst_16 {dimension_numbers = #tpu.dot_dimension_numbers<[1], [0], [0], [1], [0, 0, 1, 1], [], []>} : vector<8x8xf32>, vector<8x256xf32>, vector<8x256xf32> -> vector<8x256xf32>
    %26 = arith.addf %25, %8 : vector<8x256xf32>
    %cst_17 = arith.constant 1.000000e-03 : f32
    %27 = vector.broadcast %cst_17 : f32 to vector<8x256xf32>
    %28 = arith.maximumf %26, %27 : vector<8x256xf32>
    %29 = arith.subf %28, %20 : vector<8x256xf32>
    %30 = vector.broadcast %1 : f32 to vector<8x256xf32>
    %31 = arith.mulf %30, %29 : vector<8x256xf32>
    %32 = arith.addf %28, %31 : vector<8x256xf32>
    %cst_18 = arith.constant dense<0.000000e+00> : vector<8x256xf32>
    %33 = tpu.matmul %3, %32, %cst_18 {dimension_numbers = #tpu.dot_dimension_numbers<[1], [0], [0], [1], [0, 0, 1, 1], [], []>} : vector<8x8xf32>, vector<8x256xf32>, vector<8x256xf32> -> vector<8x256xf32>
    %34 = arith.addf %33, %8 : vector<8x256xf32>
    %cst_19 = arith.constant 1.000000e-03 : f32
    %35 = vector.broadcast %cst_19 : f32 to vector<8x256xf32>
    %36 = arith.maximumf %34, %35 : vector<8x256xf32>
    %c0_20 = arith.constant 0 : index
    %c0_21 = arith.constant 0 : index
    %c0_22 = arith.constant 0 : index
    %37 = vector.load %arg8[%c0_20, %c0_21, %c0_22] : memref<1x8x256xf32, #tpu.memory_space<vmem>>, vector<1x8x256xf32>
    %38 = vector.shape_cast %37 : vector<1x8x256xf32> to vector<8x256xf32>
    %39 = vector.shape_cast %36 : vector<8x256xf32> to vector<1x8x256xf32>
    tpu.vector_store %arg8[%c0_20, %c0_21, %c0_22], %39 {strides = array<i32>} : memref<1x8x256xf32, #tpu.memory_space<vmem>>, vector<1x8x256xf32>,
    %c0_23 = arith.constant 0 : index
    %c0_24 = arith.constant 0 : index
    %c0_25 = arith.constant 0 : index
    %40 = vector.load %arg9[%c0_23, %c0_24, %c0_25] : memref<1x8x256xf32, #tpu.memory_space<vmem>>, vector<1x8x256xf32>
    %41 = vector.shape_cast %40 : vector<1x8x256xf32> to vector<8x256xf32>
    %42 = vector.shape_cast %28 : vector<8x256xf32> to vector<1x8x256xf32>
    tpu.vector_store %arg9[%c0_23, %c0_24, %c0_25], %42 {strides = array<i32>} : memref<1x8x256xf32, #tpu.memory_space<vmem>>, vector<1x8x256xf32>,
    return
  }
  func.func @transform_0(%arg0: i32, %arg1: i32) -> i32 {
    %c0_i32 = arith.constant 0 : i32
    %c0_i32_0 = arith.constant 0 : i32
    return %c0_i32 : i32
  }
  func.func @transform_1(%arg0: i32, %arg1: i32) -> (i32, i32, i32) {
    %c0_i32 = arith.constant 0 : i32
    %c0_i32_0 = arith.constant 0 : i32
    %c0_i32_1 = arith.constant 0 : i32
    return %arg0, %c0_i32, %c0_i32_0 : i32, i32, i32
  }
  func.func @transform_2(%arg0: i32, %arg1: i32) -> (i32, i32, i32) {
    %c0_i32 = arith.constant 0 : i32
    %c0_i32_0 = arith.constant 0 : i32
    %c0_i32_1 = arith.constant 0 : i32
    return %arg0, %c0_i32, %c0_i32_0 : i32, i32, i32
  }
  func.func @transform_3(%arg0: i32, %arg1: i32) -> (i32, i32, i32) {
    %c0_i32 = arith.constant 0 : i32
    %c0_i32_0 = arith.constant 0 : i32
    return %arg0, %c0_i32, %arg1 : i32, i32, i32
  }
  func.func @transform_4(%arg0: i32, %arg1: i32) -> (i32, i32, i32) {
    %c0_i32 = arith.constant 0 : i32
    %c0_i32_0 = arith.constant 0 : i32
    return %arg0, %c0_i32, %arg1 : i32, i32, i32
  }
  func.func @transform_5(%arg0: i32, %arg1: i32) -> (i32, i32, i32) {
    %c0_i32 = arith.constant 0 : i32
    %c0_i32_0 = arith.constant 0 : i32
    return %arg0, %c0_i32, %arg1 : i32, i32, i32
  }
  func.func @transform_6(%arg0: i32, %arg1: i32) -> (i32, i32, i32) {
    %c0_i32 = arith.constant 0 : i32
    %c0_i32_0 = arith.constant 0 : i32
    return %arg0, %c0_i32, %arg1 : i32, i32, i32
  }
  func.func @transform_7(%arg0: i32, %arg1: i32) -> (i32, i32, i32) {
    %c0_i32 = arith.constant 0 : i32
    %c0_i32_0 = arith.constant 0 : i32
    return %arg0, %c0_i32, %arg1 : i32, i32, i32
  }
}

</mosaic_0001>

<bundles_post_ra>
// kernel: tpu_custom_call.1
= control target key start
LH: loop header
LB: loop body
LE: loop exit
PB: predicated region body
PF: predicated region fallthrough
CT: control target
= control target key end

     0   :  { %s1974_s0 = inlined_call_operand.hbm [shape: f32[2], index: 0, kind: input, shape index: {}]   ;;  %s1975_s1 = inlined_call_operand.hbm [shape: f32[2,8,8], index: 1, kind: input, shape index: {}]   ;;  %s1976_s2 = inlined_call_operand.hbm [shape: f32[2,8,8], index: 2, kind: input, shape index: {}]   ;;  %s1977_s3 = inlined_call_operand.hbm [shape: f32[2,8,256], index: 3, kind: input, shape index: {}]   ;;  %s1978_s4 = inlined_call_operand.hbm [shape: f32[2,8,256], index: 4, kind: input, shape index: {}]   ;;  %s1979_s5 = inlined_call_operand.hbm [shape: f32[2,8,256], index: 5, kind: input, shape index: {}]   ;;  %s1980_s6 = inlined_call_operand.hbm [shape: f32[2,8,256], index: 6, kind: output, shape index: {0}]   ;;  %s1981_s7 = inlined_call_operand.hbm [shape: f32[2,8,256], index: 7, kind: output, shape index: {1}]  }
   0x1   :  { %1999 = sst [smem:[#allocation28_spill]] %s1976_s2 }
   0x2   :  { %2000 = sst [smem:[#allocation29_spill]] %s1978_s4 }
   0x3   :  { %13 = vsyncpa [#allocation5], 0 }
   0x4   :  { %14 = vsyncpa [#allocation3], 0 }
   0x5   :  { %16 = vsyncpa [#allocation3 + $0x1], 0 }
   0x6   :  { %17 = vsyncpa [#allocation8], 0 }
   0x7   :  { %19 = vsyncpa [#allocation8 + $0x1], 0 }
   0x8   :  { %20 = vsyncpa [#allocation11], 0 }
   0x9   :  { %22 = vsyncpa [#allocation11 + $0x1], 0 }
   0xa   :  { %23 = vsyncpa [#allocation4], 0 }
   0xb   :  { %25 = vsyncpa [#allocation4 + $0x1], 0 }
   0xc   :  { %26 = vsyncpa [#allocation15], 0 }
   0xd   :  { %28 = vsyncpa [#allocation15 + $0x1], 0  ;;  %s1568_s24 = smov 0   ;;  %s1570_s25 = smov 0  }
   0xe   :  { %s1572_s26 = smov 0   ;;  %s1574_s27 = smov 0  }
   0xf   :  { %s1576_s28 = smov 0   ;;  %s1578_s29 = smov 0  }
  0x10 LB: > { %2001 = sst [smem:[#allocation22_spill]] %s1505_s26  ;;  %s46_s30 = sadd.s32 1, %s1513_s28  ;;  %s1517_s29 = sphi %s1578_s29, %s34_s29   ;;  %s1513_s28 = sphi %s1576_s28, %s2037_s28   ;;  %s1509_s27 = sphi %s1574_s27, %s2036_s27   ;;  %s1505_s26 = sphi %s1572_s26, %s2035_s26   ;;  %s1501_s25 = sphi %s1570_s25, %s2039_s25   ;;  %s1497_s24 = sphi %s1568_s24, %s2038_s24  }
  0x11   : > { %2002 = sst [smem:[#allocation23_spill]] %s1513_s28  ;;  %s74_s8 = sadd.s32 1, %s1505_s26 }
  0x12   : > { %2003 = sst [smem:[#allocation24_spill]] %s1517_s29  ;;  %p48_p0 = scmp.ge.s32.totalorder %s46_s30, 2 }
  0x13   : > { %p1984_p1 = scmp.ne.s32.totalorder %s1505_s26, %s1501_s25  ;;  %p82_p2 = scmp.eq.s32.totalorder %s1517_s29, 0 }
  0x14   : > { %s2041_s30 = smov (%p48_p0, %s46_s30), 0  ;;  %p1175_p5 = scmp.lt.s32.totalorder %s1517_s29, 2 }
  0x15   : > { %2004 = sst [smem:[#allocation25_spill]] %s2041_s30  ;;  %p83_p4 = por %p82_p2, %p1984_p1 }
  0x16   : > { %s71_s9 = ssub.s32 %s1513_s28, %s2041_s30  ;;  %s1613_s10 = sand.u32 1, %s1505_s26  }
  0x17   : > { %p72_p6 = scmp.eq.s32.totalorder %s71_s9, 0  ;;  %s1982_s11 = sshll.u32 %s1613_s10, 3 }
  0x18   : > { %s1983_s12 = sshll.u32 %s1513_s28, 7  ;;  %p1617_p7 = pnand %p1175_p5, %p83_p4 }
  0x19   : > { %s1622_s14 = scalar_select %p72_p6, %s1505_s26, %s74_s8  }
  0x1a   : > { %s2005_s13 = scalar_select %p1617_p7, 1, 0 }
  0x1b   : > { %2006 = sst [smem:[#allocation26_spill]] %s1622_s14  ;;  %s304_s15 = sand.u32 1, %s1517_s29  }
  0x1c   : > { %s2007_s2 = sld [smem:[#allocation28_spill]]  ;;  %s308_s19 = scalar_lea.vmem [#allocation7], %s1982_s11 }
  0x1d   : > { %s315_s20 = sshll.u32 %s308_s19, 4  ;;  %s1637_s21 = sshll.u32 %s1613_s10, 4  ;;  %s1634_s20 = int_to_ptr.vmem [resolvable:$true] %s315_s20 }
  0x1e   : > { %s1641_s22 = scalar_lea.sflag [#allocation8], %s304_s15  ;;  %p1647_p9 = pneg %p1617_p7 }
  0x22   : > { %s1630_s18 = scalar_lea.hbm %s2007_s2, %s1983_s12  ;;  %s1233_s17 = scalar_lea.hbm %s2007_s2, 256 }
  0x23   : > { %s1228_s23 = scalar_lea.hbm %s1630_s18, 128  ;;  %p1234_p12 = scmp.lt.u32.totalorder %s1630_s18, %s2007_s2 }
  0x24   : > { %p1229_p8 = scmp.ne.s32.totalorder %s1630_s18, %s1228_s23  ;;  %p1235_p13 = scmp.lt.u32.totalorder %s1233_s17, %s1228_s23 }
  0x25   : > { %p1237_p2 = scmp.lt.u32.totalorder %s1228_s23, %s1630_s18 }
  0x26   : > { %p1231_p10 = pnand %p1647_p9, %p1229_p8  ;;  %p1236_p0 = por %p1235_p13, %p1234_p12 }
  0x28   : > { %p1232_p11 = pneg %p1231_p10  ;;  %p1238_p4 = por %p1237_p2, %p1236_p0 }
  0x2a   : > { %p1239_p5 = pnand %p1238_p4, %p1232_p11 }
  0x2c   : > { %1242 = shalt.err (!%p1239_p5)
}
  0x2d   : > { %s1243_s12 = scalar_lea.vmem %s1634_s20, 128  ;;  %s1519_s9 = smov [#allocation7]  }
  0x2e   : > { %p1244_p6 = scmp.ne.s32.totalorder %s1634_s20, %s1243_s12  ;;  %s1248_s16 = sshll.u32 %s1519_s9, 4  ;;  %s1249_s16 = int_to_ptr.vmem [resolvable:$false] %s1248_s16 }
  0x2f   : > { %s1250_s11 = scalar_lea.vmem %s1249_s16, 256  ;;  %p1251_p3 = scmp.lt.s32.totalorder %s1634_s20, %s1249_s16 }
  0x30   : > { %p1246_p8 = pnand %p1244_p6, %p1647_p9  ;;  %p1252_p1 = scmp.lt.s32.totalorder %s1250_s11, %s1243_s12 }
  0x32   : > { %p1247_p10 = pneg %p1246_p8  ;;  %p1253_p12 = por %p1252_p1, %p1251_p3 }
  0x34   : > { %p1254_p13 = pnand %p1253_p12, %p1247_p10 }
  0x36   : > { %1257 = shalt.err (!%p1254_p13)
}
  0x37   : > { %1157 = dma.hbm_to_vmem [thread:$0]  (!%p1617_p7), %s1630_s18, 128, %s1634_s20, %s1641_s22  }
  0x38   : > { %s1672_s23 = sshll.u32 %s1513_s28, 8  ;;  %s2009_s4 = sld [smem:[#allocation29_spill]] }
  0x39   : > { %s347_s9 = scalar_lea.vmem [#allocation10], %s1637_s21  ;;  %s1683_s11 = scalar_lea.sflag [#allocation11], %s304_s15 }
  0x3a   : > { %s357_s16 = sshll.u32 %s347_s9, 4  ;;  %s358_s16 = int_to_ptr.vmem [resolvable:$true] %s357_s16 }
  0x3e   : > { %s1678_s12 = scalar_lea.hbm %s2009_s4, %s1672_s23  ;;  %s1263_s17 = scalar_lea.hbm %s2009_s4, 512 }
  0x3f   : > { %s1258_s2 = scalar_lea.hbm %s1678_s12, 256  ;;  %p1264_p0 = scmp.lt.u32.totalorder %s1678_s12, %s2009_s4 }
  0x40   : > { %p1259_p1 = scmp.ne.s32.totalorder %s1678_s12, %s1258_s2  ;;  %p1265_p2 = scmp.lt.u32.totalorder %s1263_s17, %s1258_s2 }
  0x41   : > { %p1267_p5 = scmp.lt.u32.totalorder %s1258_s2, %s1678_s12 }
  0x42   : > { %p1261_p3 = pnand %p1259_p1, %p1647_p9  ;;  %p1266_p4 = por %p1265_p2, %p1264_p0 }
  0x44   : > { %p1262_p11 = pneg %p1261_p3  ;;  %p1268_p6 = por %p1267_p5, %p1266_p4 }
  0x46   : > { %p1269_p8 = pnand %p1268_p6, %p1262_p11 }
  0x48   : > { %1272 = shalt.err (!%p1269_p8)
}
  0x49   : > { %s1273_s15 = scalar_lea.vmem %s358_s16, 256  ;;  %s1520_s9 = smov [#allocation10]  }
  0x4a   : > { %p1274_p10 = scmp.ne.s32.totalorder %s358_s16, %s1273_s15  ;;  %s1278_s14 = sshll.u32 %s1520_s9, 4  ;;  %s1279_s14 = int_to_ptr.vmem [resolvable:$false] %s1278_s14 }
  0x4b   : > { %s1280_s18 = scalar_lea.vmem %s1279_s14, 512  ;;  %p1281_p1 = scmp.lt.s32.totalorder %s358_s16, %s1279_s14 }
  0x4c   : > { %p1276_p12 = pnand %p1274_p10, %p1647_p9  ;;  %p1282_p3 = scmp.lt.s32.totalorder %s1280_s18, %s1273_s15 }
  0x4e   : > { %p1277_p13 = pneg %p1276_p12  ;;  %p1283_p7 = por %p1282_p3, %p1281_p1 }
  0x50   : > { %p1284_p0 = pnand %p1283_p7, %p1277_p13 }
  0x52   : > { %1287 = shalt.err (!%p1284_p0)
}
  0x53   : > { %p2010_p2 = scmp.ne.s32.totalorder %s2005_s13, 0  ;;  %s1704_s2 = sadd.s32 4294967295, %s1517_s29  }
  0x54   : > { %s1086_s30 = sadd.s32 4294967294, %s1517_s29   ;;  %p87_p7 = scmp.ne.s32.totalorder %s1501_s25, %s1497_s24 }
  0x55   : > { %1163 = dma.hbm_to_vmem [thread:$0]  (!%p2010_p2), %s1678_s12, 256, %s358_s16, %s1683_s11  }
  0x56   : > { %p1993_p11 = scmp.eq.s32.totalorder %s1704_s2, 0  ;;  %p223_p4 = scmp.eq.s32.totalorder %s1704_s2, 1 }
  0x57   : > { %p229_p5 = scmp.eq.s32.totalorder %s1086_s30, 1  ;;  %p1087_p8 = scmp.ge.s32.totalorder %s1517_s29, 1 }
  0x58   : > { %p1713_p6 = por %p1993_p11, %p87_p7  ;;  %p2012_p10 = scmp.ne.s32.totalorder %s1505_s26, %s1501_s25 }
  0x59   : > { %p1725_p13 = por %p229_p5, %p87_p7  ;;  %p264_p1 = scmp.lt.s32.totalorder %s1517_s29, 3 }
  0x5a   : > { %s2011_s14 = scalar_select %p1713_p6, 1, 0 }
  0x5b   : > { %p1721_p12 = por %p223_p4, %p2012_p10  ;;  %p1730_p3 = pnand %p1087_p8, %p264_p1 }
  0x5c   : > { %s2014_s16 = scalar_select %p1725_p13, 1, 0 }
  0x5d   : > { %s2013_s12 = scalar_select %p1721_p12, 1, 0 }
  0x5e   : > { %2015 = sst [smem:[#allocation27_spill]] %s2014_s16  ;;  %s2017_s17 = sshll.u32 %s1513_s28, 7 }
  0x5f   : > { %s2016_s20 = scalar_select %p1730_p3, 1, 0 }
  0x60   : > { %s1739_s9 = scalar_lea.hbm %s1975_s1, %s2017_s17  ;;  %s2018_s18 = sshll.u32 %s1613_s10, 3 }
  0x61   : > { %s290_s30 = scalar_lea.vmem [#allocation6], %s2018_s18  ;;  %s287_s26 = scalar_lea.sflag [#allocation3], %s1613_s10 }
  0x62   : > { %s297_s4 = sshll.u32 %s290_s30, 4  ;;  %s1288_s29 = scalar_lea.hbm %s1739_s9, 128  ;;  %s298_s4 = int_to_ptr.vmem [resolvable:$true] %s297_s4 }
  0x63   : > { %p1289_p7 = scmp.ne.s32.totalorder %s1739_s9, %s1288_s29  ;;  %s1293_s17 = scalar_lea.hbm %s1975_s1, 256 }
  0x64   : > { %p1294_p8 = scmp.lt.u32.totalorder %s1739_s9, %s1975_s1  ;;  %p1295_p10 = scmp.lt.u32.totalorder %s1293_s17, %s1288_s29 }
  0x65   : > { %p1291_p4 = pnand %p1289_p7, %p1647_p9  ;;  %p1297_p11 = scmp.lt.u32.totalorder %s1288_s29, %s1739_s9 }
  0x66   : > { %p1296_p1 = por %p1295_p10, %p1294_p8 }
  0x67   : > { %p1292_p5 = pneg %p1291_p4 }
  0x68   : > { %p1298_p13 = por %p1297_p11, %p1296_p1 }
  0x6a   : > { %p1299_p0 = pnand %p1298_p13, %p1292_p5 }
  0x6c   : > { %1302 = shalt.err (!%p1299_p0)
}
  0x6d   : > { %s1303_s10 = scalar_lea.vmem %s298_s4, 128  ;;  %s1521_s18 = smov [#allocation6]  }
  0x6e   : > { %p1304_p12 = scmp.ne.s32.totalorder %s298_s4, %s1303_s10  ;;  %s1308_s30 = sshll.u32 %s1521_s18, 4  ;;  %s1309_s30 = int_to_ptr.vmem [resolvable:$false] %s1308_s30 }
  0x6f   : > { %s1310_s19 = scalar_lea.vmem %s1309_s30, 256  ;;  %p1311_p6 = scmp.lt.s32.totalorder %s298_s4, %s1309_s30 }
  0x70   : > { %p1306_p7 = pnand %p1304_p12, %p1647_p9  ;;  %p1312_p3 = scmp.lt.s32.totalorder %s1310_s19, %s1303_s10 }
  0x72   : > { %p1307_p4 = pneg %p1306_p7  ;;  %p1313_p2 = por %p1312_p3, %p1311_p6 }
  0x74   : > { %p1314_p8 = pnand %p1313_p2, %p1307_p4 }
  0x76   : > { %1317 = shalt.err (!%p1314_p8)
}
  0x77   : > { %p2019_p10 = scmp.ne.s32.totalorder %s2005_s13, 0  ;;  %p2020_p11 = scmp.eq.s32.totalorder %s1704_s2, 0 }
  0x78   : > { %p2021_p12 = scmp.ne.s32.totalorder %s2016_s20, 0  ;;  %s1776_s15 = scalar_lea.hbm %s1977_s3, %s1672_s23 }
  0x79   : > { %1154 = dma.hbm_to_vmem [thread:$0]  (!%p2019_p10), %s1739_s9, 128, %s298_s4, %s287_s26  }
  0x7a   : > { %p2022_p13 = pneg %p2021_p12  ;;  %s326_s17 = scalar_lea.vmem [#allocation9], %s1637_s21 }
  0x7b   : > { %s336_s10 = sshll.u32 %s326_s17, 4  ;;  %s1318_s4 = scalar_lea.hbm %s1974_s0, 16  ;;  %s1779_s10 = int_to_ptr.vmem [resolvable:$true] %s336_s10 }
  0x7c   : > { %p1768_p0 = pnand %p2022_p13, %p2020_p11  ;;  %p1319_p2 = scmp.ne.s32.totalorder %s1974_s0, %s1318_s4 }
  0x7d   : > { %p1325_p1 = scmp.lt.u32.totalorder %s1318_s4, %s1974_s0 }
  0x7e   : > { %p1320_p6 = pneg %p1768_p0 }
  0x80   : > { %p1321_p3 = pnand %p1320_p6, %p1319_p2 }
  0x82   : > { %p1322_p5 = pneg %p1321_p3 }
  0x84   : > { %p1327_p7 = pnand %p1325_p1, %p1322_p5 }
  0x86   : > { %1330 = shalt.err (!%p1327_p7)
}
  0x87   : > { %s1522_s16 = smov [#allocation2]   ;;  %s1331_s30 = scalar_lea.hbm %s1776_s15, 256 }
  0x88   : > { %1150 = dma.hbm_to_smem (!%p1768_p0), %s1974_s0, 16, %s1522_s16, [#allocation5]  }
  0x89   : > { %p1332_p4 = scmp.ne.s32.totalorder %s1776_s15, %s1331_s30  ;;  %s1336_s9 = scalar_lea.hbm %s1977_s3, 512 }
  0x8a   : > { %p1337_p13 = scmp.lt.u32.totalorder %s1776_s15, %s1977_s3  ;;  %p1338_p2 = scmp.lt.u32.totalorder %s1336_s9, %s1331_s30 }
  0x8b   : > { %p1334_p8 = pnand %p1332_p4, %p1647_p9  ;;  %p1340_p3 = scmp.lt.u32.totalorder %s1331_s30, %s1776_s15 }
  0x8c   : > { %p1339_p6 = por %p1338_p2, %p1337_p13 }
  0x8d   : > { %p1335_p11 = pneg %p1334_p8 }
  0x8e   : > { %p1341_p5 = por %p1340_p3, %p1339_p6 }
  0x90   : > { %p1342_p1 = pnand %p1341_p5, %p1335_p11 }
  0x92   : > { %1345 = shalt.err (!%p1342_p1)
}
  0x93   : > { %s1346_s29 = scalar_lea.vmem %s1779_s10, 256  ;;  %s1523_s16 = smov [#allocation9]  }
  0x94   : > { %p1347_p0 = scmp.ne.s32.totalorder %s1779_s10, %s1346_s29  ;;  %s1351_s17 = sshll.u32 %s1523_s16, 4  ;;  %s1352_s17 = int_to_ptr.vmem [resolvable:$false] %s1351_s17 }
  0x95   : > { %s1353_s18 = scalar_lea.vmem %s1352_s17, 512  ;;  %p1354_p8 = scmp.lt.s32.totalorder %s1779_s10, %s1352_s17 }
  0x96   : > { %p1349_p7 = pnand %p1347_p0, %p1647_p9  ;;  %p1355_p12 = scmp.lt.s32.totalorder %s1353_s18, %s1346_s29 }
  0x98   : > { %p1350_p4 = pneg %p1349_p7  ;;  %p1356_p13 = por %p1355_p12, %p1354_p8 }
  0x9a   : > { %p1357_p2 = pnand %p1356_p13, %p1350_p4 }
  0x9c   : > { %1360 = shalt.err (!%p1357_p2)
}
  0x9d   : > { %1160 = dma.hbm_to_vmem [thread:$0]  (!%p2019_p10), %s1776_s15, 256, %s1779_s10, %s1641_s22  }
  0x9e   : > { %s1823_s26 = scalar_lea.hbm %s1979_s5, %s1672_s23  ;;  %s368_s9 = scalar_lea.vmem [#allocation12], %s1637_s21 }
  0x9f   : > { %s378_s19 = sshll.u32 %s368_s9, 4  ;;  %s1361_s28 = scalar_lea.hbm %s1823_s26, 256  ;;  %s379_s19 = int_to_ptr.vmem [resolvable:$true] %s378_s19 }
  0xa0   : > { %p1362_p12 = scmp.ne.s32.totalorder %s1823_s26, %s1361_s28  ;;  %s1366_s22 = scalar_lea.hbm %s1979_s5, 512 }
  0xa1   : > { %p1367_p3 = scmp.lt.u32.totalorder %s1823_s26, %s1979_s5  ;;  %p1368_p5 = scmp.lt.u32.totalorder %s1366_s22, %s1361_s28 }
  0xa2   : > { %p1364_p11 = pnand %p1362_p12, %p1647_p9  ;;  %p1370_p0 = scmp.lt.u32.totalorder %s1361_s28, %s1823_s26 }
  0xa3   : > { %p1369_p1 = por %p1368_p5, %p1367_p3 }
  0xa4   : > { %p1365_p6 = pneg %p1364_p11 }
  0xa5   : > { %p1371_p7 = por %p1370_p0, %p1369_p1 }
  0xa7   : > { %p1372_p4 = pnand %p1371_p7, %p1365_p6 }
  0xa9   : > { %1375 = shalt.err (!%p1372_p4)
}
  0xaa   : > { %s1376_s21 = scalar_lea.vmem %s379_s19, 256  ;;  %s1524_s23 = smov [#allocation12]  }
  0xab   : > { %p1377_p8 = scmp.ne.s32.totalorder %s379_s19, %s1376_s21  ;;  %s1381_s17 = sshll.u32 %s1524_s23, 4  ;;  %s1382_s17 = int_to_ptr.vmem [resolvable:$false] %s1381_s17 }
  0xac   : > { %s1383_s18 = scalar_lea.vmem %s1382_s17, 512  ;;  %p1384_p12 = scmp.lt.s32.totalorder %s379_s19, %s1382_s17 }
  0xad   : > { %p1379_p13 = pnand %p1377_p8, %p1647_p9  ;;  %p1385_p11 = scmp.lt.s32.totalorder %s1383_s18, %s1376_s21 }
  0xaf   : > { %p1380_p2 = pneg %p1379_p13  ;;  %p1386_p10 = por %p1385_p11, %p1384_p12 }
  0xb1   : > { %p1387_p3 = pnand %p1386_p10, %p1380_p2 }
  0xb3   : > { %1390 = shalt.err (!%p1387_p3)
}
  0xb4   : > { %p2024_p5 = scmp.ne.s32.totalorder %s2005_s13, 0  ;;  %p2025_p6 = scmp.ne.s32.totalorder %s2016_s20, 0 }
  0xb5   : > { %p2026_p9 = scmp.eq.s32.totalorder (!%p2025_p6), %s1704_s2, 0 }
  0xb6   : > { %1166 = dma.hbm_to_vmem [thread:$0]  (!%p2024_p5), %s1823_s26, 256, %s379_s19, %s1683_s11  }
  0xb7   : > { %387 = sbr.rel (%p2025_p6) target bundleno = 897 (0x381), region = 44 }
  0xbe   : > { %1472 = dma.done.wait (%p2026_p9), [#allocation5], 16   ;;  %p2027_p1 = pmov %p2026_p9 }
  0xbf   : > { %s1851_s8 = sand.u32 1, %s1501_s25   ;;  %p2028_p10 = scmp.ne.s32.totalorder %s2011_s14, 0 }
  0xc0   : > { %1474 = vsyncadd (%p2027_p1), [#allocation5], 4294967280  ;;  %s1105_s30 = sshll.u32 %s1851_s8, 3  ;;  %s394_s13 = scalar_lea.sflag [#allocation3], %s1851_s8 }
  0xc1   : > { %s1855_s4 = scalar_lea.vmem [#allocation6], %s1105_s30 }
  0xc2   : > { %1476 = dma.done.wait (%p2028_p10), %s394_s13, 128  }
  0xc3   : > { %1478 = vsyncadd (%p2028_p10), %s394_s13, 4294967168  ;;  %s402_s11 = sand.u32 1, %s1704_s2   ;;  %s406_s26 = scalar_lea.vmem [#allocation7], %s1105_s30 }
  0xc4   : > { %s403_s20 = scalar_lea.sflag [#allocation8], %s402_s11 }
  0xc5   : > { %1480 = dma.done.wait (%p2028_p10), %s403_s20, 384  }
  0xc6   : > { %1482 = vsyncadd (%p2028_p10), %s403_s20, 4294966912  ;;  %s1867_s9 = sshll.u32 %s1851_s8, 4  ;;  %s421_s28 = scalar_lea.sflag [#allocation11], %s402_s11 }
  0xc7   : > { %s415_s19 = scalar_lea.vmem [#allocation9], %s1867_s9  ;;  %s424_s29 = scalar_lea.vmem [#allocation10], %s1867_s9 }
  0xc8   : > { %1484 = dma.done.wait (%p2028_p10), %s421_s28, 512  }
  0xc9   : > { %1486 = vsyncadd (%p2028_p10), %s421_s28, 4294966784  ;;  %s433_s2 = scalar_lea.vmem [#allocation12], %s1867_s9 }
  0xca   : > { %438 = sfence }
  0xcb   : > { %v499_v0 = vld [vmem:[%s415_s19 + $0x8] sm:$0xff]  ;;  %v498_v1 = vld [vmem:[%s415_s19] sm:$0xff]  ;;  %s495_s16 = sld [smem:[#allocation2 + %s1509_s27]]  ;;  %vm500_vm0 = vcmask 64512   ;;  %v1525_v3 = vmov 0.0   ;;  %s489_s14 = scalar_lea.vmem [#allocation14], %s1867_s9 }
  0xcc   : > { %v576_v2 = vld [vmem:[%s424_s29 + $0x8] sm:$0xff]  ;;  %504 = vmatprep.subr.mxu0 %v499_v0  ;;  %568 = vmatprep.mubr.f32.mxu0 %v1525_v3  ;;  %v575_v6 = vld [vmem:[%s424_s29] sm:$0xff]  ;;  %s1127_s22 = sshll.u32 %s1509_s27, 8  ;;  %s862_s23 = sshll.u32 %s489_s14, 4  ;;  %s863_s23 = int_to_ptr.vmem [resolvable:$true] %s862_s23 }
  0xcd   : > { %v578_v4 = vld [vmem:[%s433_s2 + $0x8] sm:$0xff]  ;;  %505 = vmatpush1.msra.mxu0 %v498_v1  ;;  %v577_v7 = vld [vmem:[%s433_s2] sm:$0xff]  ;;  %653 = vmatprep.mubr.f32.mxu1 %v1525_v3  ;;  %s1897_s21 = scalar_lea.hbm %s1981_s7, %s1127_s22  ;;  %s830_s17 = scalar_lea.sflag [#allocation15], %s1851_s8 }
  0xce   : > { %v497_v5 = vld [vmem:[%s406_s26] sm:$0xff]  ;;  %v580_v8 = vsub.f32 %v576_v2, %v578_v4  ;;  %v579_v9 = vsub.f32 %v575_v6, %v577_v7  ;;  %v496_v15 = vld [vmem:[%s1855_s4] sm:$0xff]  ;;  %s1391_s18 = scalar_lea.vmem %s863_s23, 256  ;;  %p2029_p7 = scmp.ne.s32.totalorder %s2013_s12, 0 }
  0xcf   : > { %1112 = vmatmul.mubr.msk.f32.vlgmr.msra.gmra.mrb[0].mxu0 %vm500_vm0, %v497_v5  ;;  %p1392_p0 = scmp.ne.s32.totalorder %s863_s23, %s1391_s18  ;;  %s1526_s30 = smov [#allocation14]  }
  0xd0   : > { %732 = vmatprep.mubr.f32.mxu0 %v1525_v3  ;;  %s1395_s13 = sshll.u32 %s1526_s30, 4  ;;  %s1396_s13 = int_to_ptr.vmem [resolvable:$false] %s1395_s13 }
  0xd1   : > { %v581_v10 = vstv %s495_s16  ;;  %p1393_p4 = pnand %p1392_p0, %p2029_p7  ;;  %s1397_s4 = scalar_lea.vmem %s1396_s13, 512 }
  0xd2   : > { %v583_v11 = vmul.f32 %v581_v10, %v580_v8  ;;  %v582_v12 = vmul.f32 %v581_v10, %v579_v9  ;;  %p1398_p13 = scmp.lt.s32.totalorder %s863_s23, %s1396_s13  ;;  %p1399_p2 = scmp.lt.s32.totalorder %s1397_s4, %s1391_s18 }
  0xd3   : > { %p1394_p8 = pneg %p1393_p4 }
  0xd4   : > { %v585_v13 = vadd.f32 %v583_v11, %v576_v2  ;;  %v584_v14 = vadd.f32 %v582_v12, %v575_v6  ;;  %p1400_p12 = por %p1399_p2, %p1398_p13 }
  0xd6   : > { %589 = vmatprep.subr.mxu1 %v585_v13  ;;  %p1401_p11 = pnand %p1400_p12, %p1394_p8 }
  0xd7   : > { %590 = vmatpush1.msra.mxu1 %v584_v14 }
  0xd8   : > { %1113 = vmatmul.mubr.msk.f32.vlgmr.msra.gmra.mrb[0].mxu1 %vm500_vm0, %v496_v15 }
  0xd9   : > { %811 = vmatprep.mubr.f32.mxu1 %v1525_v3 }
 0x1a2   : > { %v1880_v16 = vpop.f32.mrb[0].mxu0 }
 0x1a3   : > { %v1882_v17 = vpop.f32.mrb[1].mxu0 }
 0x1ab   : > { %v655_v18 = vpop.f32.mrb[0].mxu1 }
 0x1ac   : > { %v656_v19 = vadd.f32 %v655_v18, %v1880_v16  ;;  %v657_v20 = vpop.f32.mrb[1].mxu1 }
 0x1ad   : > { %v658_v21 = vadd.f32 %v657_v20, %v1882_v17 }
 0x1ae   : > { %v660_v22 = vmax.f32 %v656_v19, 0.001 }
 0x1af   : > { %v661_v23 = vmax.f32 %v658_v21, 0.001 }
 0x1b0   : > { %v662_v24 = vsub.f32 %v660_v22, %v575_v6 }
 0x1b1   : > { %v663_v25 = vsub.f32 %v661_v23, %v576_v2 }
 0x1b2   : > { %v664_v26 = vmul.f32 %v662_v24, %v581_v10 }
 0x1b3   : > { %v665_v27 = vmul.f32 %v663_v25, %v581_v10 }
 0x1b4   : > { %v666_v29 = vadd.f32 %v664_v26, %v660_v22 }
 0x1b5   : > { %v667_v28 = vadd.f32 %v665_v27, %v661_v23 }
 0x1b7   : > { %668 = vmatprep.subr.mxu0 %v667_v28 }
 0x1b8   : > { %669 = vmatpush1.msra.mxu0 %v666_v29 }
 0x1b9   : > { %1114 = vmatmul.mubr.msk.f32.vlgmr.msra.gmra.mrb[2].mxu0 %vm500_vm0, %v496_v15 }
 0x28c   : > { %v734_v30 = vpop.f32.mrb[2].mxu0 }
 0x28d   : > { %v735_v31 = vadd.f32 %v734_v30, %v1880_v16  ;;  %v736_v32 = vpop.f32.mrb[3].mxu0 }
 0x28e   : > { %v737_v33 = vadd.f32 %v736_v32, %v1882_v17 }
 0x28f   : > { %v739_v34 = vmax.f32 %v735_v31, 0.001 }
 0x290   : > { %v740_v35 = vmax.f32 %v737_v33, 0.001 }
 0x291   : > { %v741_v36 = vsub.f32 %v739_v34, %v660_v22  ;;  %822 = vst [vmem:[%s489_s14] sm:$0xff] %v739_v34 }
 0x292   : > { %v742_v37 = vsub.f32 %v740_v35, %v661_v23  ;;  %823 = vst [vmem:[%s489_s14 + $0x8] sm:$0xff] %v740_v35 }
 0x293   : > { %v743_v38 = vmul.f32 %v741_v36, %v581_v10 }
 0x294   : > { %v744_v39 = vmul.f32 %v742_v37, %v581_v10 }
 0x295   : > { %v745_v41 = vadd.f32 %v743_v38, %v739_v34 }
 0x296   : > { %v746_v40 = vadd.f32 %v744_v39, %v740_v35 }
 0x298   : > { %747 = vmatprep.subr.mxu1 %v746_v40 }
 0x299   : > { %748 = vmatpush1.msra.mxu1 %v745_v41 }
 0x29a   : > { %1115 = vmatmul.mubr.msk.f32.vlgmr.msra.gmra.mrb[2].mxu1 %vm500_vm0, %v496_v15 }
 0x29b   : > { %1404 = shalt.err (!%p1401_p11)
}
 0x29c   : > { %s1405_s11 = scalar_lea.hbm %s1897_s21, 256  ;;  %s1409_s19 = scalar_lea.hbm %s1981_s7, 512 }
 0x29d   : > { %p1406_p3 = scmp.ne.s32.totalorder %s1897_s21, %s1405_s11  ;;  %p1410_p9 = scmp.lt.u32.totalorder %s1897_s21, %s1981_s7 }
 0x29e   : > { %p1411_p1 = scmp.lt.u32.totalorder %s1409_s19, %s1405_s11  ;;  %p1413_p0 = scmp.lt.u32.totalorder %s1405_s11, %s1897_s21 }
 0x29f   : > { %p1407_p5 = pnand %p1406_p3, %p2029_p7 }
 0x2a0   : > { %p1412_p10 = por %p1411_p1, %p1410_p9 }
 0x2a1   : > { %p1408_p6 = pneg %p1407_p5 }
 0x2a2   : > { %p1414_p4 = por %p1413_p0, %p1412_p10 }
 0x2a4   : > { %p1415_p8 = pnand %p1414_p4, %p1408_p6 }
 0x2a6   : > { %1418 = shalt.err (!%p1415_p8)
}
 0x2a7   : > { %1144 = dma.vmem_to_hbm [thread:$0]  (%p2029_p7), %s863_s23, 256, %s1897_s21, %s830_s17  }
 0x2a8   : > { %s482_s2 = scalar_lea.vmem [#allocation13], %s1867_s9  ;;  %s1925_s10 = scalar_lea.hbm %s1980_s6, %s1127_s22 }
 0x2a9   : > { %s846_s16 = sshll.u32 %s482_s2, 4  ;;  %s825_s21 = scalar_lea.sflag [#allocation4], %s1851_s8  ;;  %s1927_s16 = int_to_ptr.vmem [resolvable:$true] %s846_s16 }
 0x2aa   : > { %s1419_s9 = scalar_lea.vmem %s1927_s16, 256  ;;  %s1527_s23 = smov [#allocation13]  }
 0x2ab   : > { %p1420_p13 = scmp.ne.s32.totalorder %s1927_s16, %s1419_s9  ;;  %s1423_s27 = sshll.u32 %s1527_s23, 4  ;;  %s1424_s27 = int_to_ptr.vmem [resolvable:$false] %s1423_s27 }
 0x2ac   : > { %s1425_s17 = scalar_lea.vmem %s1424_s27, 512  ;;  %p1426_p11 = scmp.lt.s32.totalorder %s1927_s16, %s1424_s27 }
 0x2ad   : > { %p1421_p2 = pnand %p1420_p13, %p2029_p7  ;;  %p1427_p3 = scmp.lt.s32.totalorder %s1425_s17, %s1419_s9 }
 0x2af   : > { %p1422_p12 = pneg %p1421_p2  ;;  %p1428_p5 = por %p1427_p3, %p1426_p11 }
 0x2b1   : > { %p1429_p6 = pnand %p1428_p5, %p1422_p12 }
 0x36d   : > { %v813_v42 = vpop.f32.mrb[2].mxu1 }
 0x36e   : > { %v814_v43 = vadd.f32 %v813_v42, %v1880_v16  ;;  %v815_v44 = vpop.f32.mrb[3].mxu1 }
 0x36f   : > { %v816_v45 = vadd.f32 %v815_v44, %v1882_v17 }
 0x370   : > { %v818_v46 = vmax.f32 %v814_v43, 0.001 }
 0x371   : > { %v819_v47 = vmax.f32 %v816_v45, 0.001 }
 0x372   : > { %820 = vst [vmem:[%s482_s2] sm:$0xff] %v818_v46 }
 0x373   : > { %821 = vst [vmem:[%s482_s2 + $0x8] sm:$0xff] %v819_v47 }
 0x374   : > { %1432 = shalt.err (!%p1429_p6)
}
 0x375   : > { %s1433_s8 = scalar_lea.hbm %s1925_s10, 256  ;;  %s1437_s30 = scalar_lea.hbm %s1980_s6, 512 }
 0x376   : > { %p1434_p9 = scmp.ne.s32.totalorder %s1925_s10, %s1433_s8  ;;  %p1438_p0 = scmp.lt.u32.totalorder %s1925_s10, %s1980_s6 }
 0x377   : > { %p1439_p4 = scmp.lt.u32.totalorder %s1437_s30, %s1433_s8  ;;  %p1441_p13 = scmp.lt.u32.totalorder %s1433_s8, %s1925_s10 }
 0x378   : > { %p1435_p1 = pnand %p1434_p9, %p2029_p7 }
 0x379   : > { %p1440_p8 = por %p1439_p4, %p1438_p0 }
 0x37a   : > { %p1436_p10 = pneg %p1435_p1 }
 0x37b   : > { %p1442_p2 = por %p1441_p13, %p1440_p8 }
 0x37d   : > { %p1443_p12 = pnand %p1442_p2, %p1436_p10 }
 0x37f   : > { %1446 = shalt.err (!%p1443_p12)
}
 0x380   : > { %1143 = dma.vmem_to_hbm [thread:$0]  (%p2029_p7), %s1927_s16, 256, %s1925_s10, %s825_s21  }
 0x381 PF: > { %s2030_s11 = sld [smem:[#allocation27_spill]]  ;;  %s2031_s20 = sld [smem:[#allocation24_spill]] }
 0x382   : > { %s874_s26 = sand.u32 1, %s1497_s24  }
 0x383   : > { %s875_s19 = scalar_lea.sflag [#allocation4], %s874_s26 }
 0x387   : > { %p2032_p11 = scmp.ne.s32.totalorder %s2030_s11, 0  ;;  %p2033_p3 = scmp.ge.s32.totalorder %s2031_s20, 2 }
 0x389   : > { %p1168_p5 = pnand %p2033_p3, %p2032_p11 }
 0x38b   : > { %1488 = dma.done.wait (!%p1168_p5), %s875_s19, 256  }
 0x38c   : > { %1490 = vsyncadd (!%p1168_p5), %s875_s19, 4294967040  ;;  %s884_s28 = scalar_lea.sflag [#allocation15], %s874_s26 }
 0x38d   : > { %1492 = dma.done.wait (!%p1168_p5), %s884_s28, 256  }
 0x38e   : > { %1494 = vsyncadd (!%p1168_p5), %s884_s28, 4294967040  ;;  %s34_s29 = sadd.s32 1, %s2031_s20   ;;  %s2034_s12 = sld [smem:[#allocation22_spill]] }
 0x38f   : > { %p31_p6 = scmp.ge.s32.totalorder %s34_s29, 4   ;;  %s2035_s26 = sld [smem:[#allocation26_spill]] }
 0x390   : > { %s2036_s27 = sld [smem:[#allocation23_spill]]  ;;  %s2037_s28 = sld [smem:[#allocation25_spill]] }
 0x391   : > { %s2038_s24 = smov %s1501_s25  ;;  %33 = sbr.rel (!%p31_p6) target bundleno = 16 (0x10), region = 159 }
 0x394   : > { %s2039_s25 = smov %s2034_s12 }
 0x398   :  { %889 = vsyncpa [#allocation3], 1 }
 0x399   :  { %891 = vsyncpa [#allocation3 + $0x1], 1 }
 0x39a   :  { %892 = vsyncpa [#allocation8], 1 }
 0x39b   :  { %894 = vsyncpa [#allocation8 + $0x1], 1 }
 0x39c   :  { %895 = vsyncpa [#allocation11], 1 }
 0x39d   :  { %897 = vsyncpa [#allocation11 + $0x1], 1 }
 0x39e   :  { %898 = vsyncpa [#allocation4], 1 }
 0x39f   :  { %900 = vsyncpa [#allocation4 + $0x1], 1 }
 0x3a0   :  { %901 = vsyncpa [#allocation15], 1 }
 0x3a1   :  { %903 = vsyncpa [#allocation15 + $0x1], 1 }
 0x3a2   :  { %904 = vsyncpa [#allocation5], 1 }
 0x3a3   :  { %906 = vsyncpa [#allocation5 + $0x1], 1 }

</bundles_post_ra>
